<compile_context>
chip_gen: v6e
topology: v6e:2x2x1
jax: 0.10.0
libtpu: 0.0.40
codegen_flags: <defaults>
</compile_context>

<pallas_src>
import functools

import jax
import jax.numpy as jnp
from jax.experimental import pallas as pl
from jax.experimental.pallas import tpu as pltpu

_MAX_COLS = 8192  # cap on the lane dimension (keeps rows >= 2 for big slabs)


def _ax_add_b_kernel(scale_ref, bias_ref, x_ref, o_ref, *, compute_dtype):
    # scale_ref / bias_ref are (1,) f32 scalars in SMEM.
    w = scale_ref[0].astype(compute_dtype)
    b = bias_ref[0].astype(compute_dtype)
    o_ref[...] = (x_ref[...].astype(compute_dtype) * w + b).astype(o_ref.dtype)


def _pick_cols(n_aligned):
    """Largest multiple of 128 (<= _MAX_COLS) dividing n_aligned (a multiple of 128)."""
    upper = min(n_aligned, _MAX_COLS)
    for cols in range(upper, 127, -128):
        if n_aligned % cols == 0:
            return cols
    return 128


def _sublane_multiple(itemsize):
    # Native sublane packing: 8 rows for 32-bit, 16 for 16-bit, 32 for 8-bit.
    return max(8, 32 // itemsize)


def _run_tiled(x2, w32, b32, out_dtype, compute_dtype):
    rows, cols = x2.shape
    in_item = x2.dtype.itemsize
    out_item = jnp.dtype(out_dtype).itemsize
    sub = max(_sublane_multiple(in_item), _sublane_multiple(out_item))

    # ~6 MiB in + ~6 MiB out per grid step; double-buffered -> ~24 MiB VMEM.
    target_step_bytes = 12 * 1024 * 1024
    row_bytes = cols * (in_item + out_item)
    tile_rows = max(1, min(rows, target_step_bytes // row_bytes))

    # v7x megacore: give the "parallel" axis at least 2 steps for non-tiny slabs
    # so both TensorCores (and their DMA engines) get work.
    if rows * cols * in_item >= (1 << 20):
        tile_rows = min(tile_rows, pl.cdiv(rows, 2))

    if tile_rows < rows:
        # Non-full-extent row blocks must be a multiple of the sublane packing.
        tile_rows = min(rows, max(sub, (tile_rows // sub) * sub))

    grid = (pl.cdiv(rows, tile_rows),)
    kernel = functools.partial(_ax_add_b_kernel, compute_dtype=compute_dtype)

    return pl.pallas_call(
        kernel,
        out_shape=jax.ShapeDtypeStruct((rows, cols), out_dtype),
        grid=grid,
        in_specs=[
            pl.BlockSpec(memory_space=pltpu.SMEM),               # weight (1,) f32
            pl.BlockSpec(memory_space=pltpu.SMEM),               # bias   (1,) f32
            pl.BlockSpec((tile_rows, cols), lambda i: (i, 0)),   # x tile
        ],
        out_specs=pl.BlockSpec((tile_rows, cols), lambda i: (i, 0)),
        compiler_params=pltpu.CompilerParams(
            dimension_semantics=("parallel",),          # megacore-shard rows (v7x)
            vmem_limit_bytes=40 * 1024 * 1024,          # <= 64 MiB v7x physical
        ),
        cost_estimate=pl.CostEstimate(
            flops=2 * rows * cols,
            transcendentals=0,
            bytes_accessed=rows * cols * (in_item + out_item),
        ),
    )(w32, b32, x2)


def my_ax_add_b(x, weight, bias):
    """Elementwise y = x * weight + bias with 1-element weight/bias (any shape x)."""
    weight = jnp.asarray(weight)
    bias = jnp.asarray(bias)
    if weight.size != 1 or bias.size != 1:
        raise ValueError("MyAxAddB expects 1-element weight and bias parameters.")

    orig_shape = x.shape
    # PyTorch-style type promotion: bf16/f16/int x with f32 params -> f32 output.
    out_dtype = jnp.result_type(x.dtype, weight.dtype, bias.dtype)
    if jnp.dtype(out_dtype) in (jnp.dtype(jnp.bfloat16), jnp.dtype(jnp.float16)):
        compute_dtype = jnp.dtype(out_dtype)   # all-low-precision: keep it narrow
    else:
        compute_dtype = jnp.dtype(jnp.float32)

    flat = x.reshape(-1)
    n = flat.shape[0]
    if n == 0:
        return jnp.zeros(orig_shape, out_dtype)

    w32 = weight.reshape(-1).astype(jnp.float32)
    b32 = bias.reshape(-1).astype(jnp.float32)

    # Aligned main body = largest prefix with length a multiple of 128.
    # For typical NN shapes that is the whole array: no pad, no slice copies.
    tail_len = n % 128
    n_main = n - tail_len

    parts = []
    if n_main > 0:
        main = flat if tail_len == 0 else jax.lax.slice(flat, (0,), (n_main,))
        cols = _pick_cols(n_main)
        x2 = main.reshape(n_main // cols, cols)       # contiguous reshape: free view
        out2 = _run_tiled(x2, w32, b32, out_dtype, compute_dtype)
        parts.append(out2.reshape(-1))
    if tail_len > 0:
        # Sub-128-lane ragged tail (< 512 bytes): a plain fused XLA op is cheaper
        # than a masked Pallas block and keeps the main kernel pad/slice free.
        tail = jax.lax.slice(flat, (n_main,), (n,))
        w_c = w32[0].astype(compute_dtype)
        b_c = b32[0].astype(compute_dtype)
        parts.append((tail.astype(compute_dtype) * w_c + b_c).astype(out_dtype))

    out_flat = parts[0] if len(parts) == 1 else jnp.concatenate(parts)
    return out_flat.reshape(orig_shape)


if __name__ == "__main__":
    key = jax.random.PRNGKey(0)
    k_x, k_w = jax.random.split(key)

    # NCHW input, small shape consistent with the module's forward.
    x = jax.random.normal(k_x, (2, 4, 16, 16), dtype=jnp.float32)

    # Module init: weights ~ randn(1), bias = zeros(1).
    weight = jax.random.normal(k_w, (1,), dtype=jnp.float32)
    bias = jnp.zeros((1,), dtype=jnp.float32)

    y = jax.block_until_ready(my_ax_add_b(x, weight, bias))
    y_ref = x * weight + bias
    assert y.shape == x.shape and y.dtype == y_ref.dtype
    assert jnp.allclose(y, y_ref, atol=1e-6, rtol=1e-6)

    # Ragged total size (3*5*7*11 = 1155): 1152-element aligned body through the
    # kernel + 3-element tail; no padded copy of the whole array is materialized.
    x_odd = jax.random.normal(k_x, (3, 5, 7, 11), dtype=jnp.float32)
    y_odd = jax.block_until_ready(my_ax_add_b(x_odd, weight, bias))
    assert y_odd.shape == x_odd.shape
    assert jnp.allclose(y_odd, x_odd * weight + bias, atol=1e-6, rtol=1e-6)

    # Mixed precision: bf16 input with f32 params promotes to f32 (PyTorch semantics).
    x_bf = x.astype(jnp.bfloat16)
    y_bf = jax.block_until_ready(my_ax_add_b(x_bf, weight, bias))
    assert y_bf.dtype == jnp.float32
    assert jnp.allclose(y_bf, x_bf.astype(jnp.float32) * weight + bias,
                        atol=1e-6, rtol=1e-6)

    print("KERNEL_OK")
</pallas_src>

<mosaic_0001>
module attributes {stable_mosaic.version = 11 : i64} {
  func.func @_ax_add_b_kernel(%arg0: i32, %arg1: memref<1xf32, #tpu.memory_space<smem>>, %arg2: memref<1xf32, #tpu.memory_space<smem>>, %arg3: memref<1x2048xf32, #tpu.memory_space<vmem>>, %arg4: memref<1x2048xf32, #tpu.memory_space<vmem>>) attributes {dimension_semantics = [#tpu.dimension_semantics<parallel>], iteration_bounds = array<i64: 1>, scalar_prefetch = 0 : i64, scratch_operands = 0 : i64, tpu.core_type = #tpu.core_type<tc>, window_params = [{transform_indices = @transform_0, window_bounds = array<i64: 1>}, {transform_indices = @transform_1, window_bounds = array<i64: 1>}, {transform_indices = @transform_2, window_bounds = array<i64: 1, 2048>}, {transform_indices = @transform_3, window_bounds = array<i64: 1, 2048>}]} {
    %c0 = arith.constant 0 : index
    %0 = memref.load %arg1[%c0] : memref<1xf32, #tpu.memory_space<smem>>
    %c0_0 = arith.constant 0 : index
    %1 = memref.load %arg2[%c0_0] : memref<1xf32, #tpu.memory_space<smem>>
    %c0_1 = arith.constant 0 : index
    %c0_2 = arith.constant 0 : index
    %2 = vector.load %arg3[%c0_1, %c0_2] : memref<1x2048xf32, #tpu.memory_space<vmem>>, vector<1x2048xf32>
    %3 = vector.broadcast %0 : f32 to vector<1x2048xf32>
    %4 = arith.mulf %2, %3 : vector<1x2048xf32>
    %5 = vector.broadcast %1 : f32 to vector<1x2048xf32>
    %6 = arith.addf %4, %5 : vector<1x2048xf32>
    %c0_3 = arith.constant 0 : index
    %c0_4 = arith.constant 0 : index
    %7 = vector.load %arg4[%c0_3, %c0_4] : memref<1x2048xf32, #tpu.memory_space<vmem>>, vector<1x2048xf32>
    tpu.vector_store %arg4[%c0_3, %c0_4], %6 {strides = array<i32>} : memref<1x2048xf32, #tpu.memory_space<vmem>>, vector<1x2048xf32>,
    return
  }
  func.func @transform_0(%arg0: i32) -> i32 {
    %c0_i32 = arith.constant 0 : i32
    %c0_i32_0 = arith.constant 0 : i32
    return %c0_i32 : i32
  }
  func.func @transform_1(%arg0: i32) -> i32 {
    %c0_i32 = arith.constant 0 : i32
    %c0_i32_0 = arith.constant 0 : i32
    return %c0_i32 : i32
  }
  func.func @transform_2(%arg0: i32) -> (i32, i32) {
    %c0_i32 = arith.constant 0 : i32
    %c0_i32_0 = arith.constant 0 : i32
    return %arg0, %c0_i32 : i32, i32
  }
  func.func @transform_3(%arg0: i32) -> (i32, i32) {
    %c0_i32 = arith.constant 0 : i32
    %c0_i32_0 = arith.constant 0 : i32
    return %arg0, %c0_i32 : i32, i32
  }
}

</mosaic_0001>

<bundles_post_ra>
// kernel: tpu_custom_call.1
= control target key start
LH: loop header
LB: loop body
LE: loop exit
PB: predicated region body
PF: predicated region fallthrough
CT: control target
= control target key end

     0   :  { %10 = vsyncpa [#allocation5], 0  ;;  %s136_s0 = inlined_call_operand.<no memory space> [shape: f32[1], index: 0, kind: input, shape index: {}]   ;;  %s137_s1 = inlined_call_operand.<no memory space> [shape: f32[1], index: 1, kind: input, shape index: {}]   ;;  %s138_s2 = inlined_call_operand.hbm [shape: f32[1,2048], index: 2, kind: input, shape index: {}]   ;;  %s139_s3 = inlined_call_operand.hbm [shape: f32[1,2048], index: 3, kind: output, shape index: {}]  }
   0x1   :  { %11 = vsyncpa [#allocation6], 0  ;;  %s102_s12 = smov [#allocation4]  }
   0x2   :  { %s22_s13 = sshll.u32 %s102_s12, 4  ;;  %s23_s13 = int_to_ptr.vmem [resolvable:$true] %s22_s13 }
   0x3   :  { %s66_s14 = scalar_lea.vmem %s23_s13, 256  ;;  %p71_p1 = scmp.lt.s32.totalorder %s23_s13, %s23_s13 }
   0x4   :  { %p67_p0 = scmp.ne.s32.totalorder %s23_s13, %s66_s14  ;;  %p72_p2 = scmp.lt.s32.totalorder %s66_s14, %s66_s14 }
   0x6   :  { %p73_p3 = por %p72_p2, %p71_p1 }
   0x8   :  { %p74_p4 = pnand %p73_p3, %p67_p0 }
   0xa   :  { %77 = shalt.err (!%p74_p4)
}
   0xb   :  { %25 = dma.hbm_to_vmem [thread:$0]  %s138_s2, 256, %s23_s13, [#allocation5]  }
   0xc   :  { %98 = dma.done.wait [#allocation5], 256  }
   0xd   :  { %99 = vsyncadd [#allocation5], 4294967040  ;;  %v33_v0 = vstv %s136_s0  ;;  %v31_v1 = vld [vmem:[#allocation4] sm:$0xff]  ;;  %v36_v2 = vstv %s137_s1  ;;  %v32_v3 = vld [vmem:[#allocation4 + $0x8] sm:$0xff]  ;;  %s103_s21 = smov [#allocation7]  }
   0xe   :  { %s47_s22 = sshll.u32 %s103_s21, 4  ;;  %v34_v4 = vmul.f32 %v33_v0, %v31_v1  ;;  %v35_v5 = vmul.f32 %v33_v0, %v32_v3  ;;  %s48_s22 = int_to_ptr.vmem [resolvable:$true] %s47_s22 }
   0xf   :  { %s78_s2 = scalar_lea.vmem %s48_s22, 256  ;;  %p83_p6 = scmp.lt.s32.totalorder %s48_s22, %s48_s22 }
  0x10   :  { %v37_v6 = vadd.f32 %v36_v2, %v34_v4  ;;  %v38_v7 = vadd.f32 %v36_v2, %v35_v5  ;;  %p79_p5 = scmp.ne.s32.totalorder %s48_s22, %s78_s2  ;;  %p84_p7 = scmp.lt.s32.totalorder %s78_s2, %s78_s2 }
  0x12   :  { %39 = vst [vmem:[#allocation7] sm:$0xff] %v37_v6  ;;  %40 = vst [vmem:[#allocation7 + $0x8] sm:$0xff] %v38_v7  ;;  %p85_p8 = por %p84_p7, %p83_p6 }
  0x14   :  { %p86_p9 = pnand %p85_p8, %p79_p5 }
  0x16   :  { %89 = shalt.err (!%p86_p9)
}
  0x17   :  { %50 = dma.vmem_to_hbm [thread:$0]  %s48_s22, 256, %s139_s3, [#allocation6]  }
  0x18   :  { %100 = dma.done.wait [#allocation6], 256  }
  0x19   :  { %101 = vsyncadd [#allocation6], 4294967040 }
  0x1a   :  { %54 = vsyncpa [#allocation5], 1 }
  0x1b   :  { %55 = vsyncpa [#allocation6], 1 }

</bundles_post_ra>
